<compile_context>
chip_gen: v6e
topology: v6e:2x2x1
jax: 0.10.0
libtpu: 0.0.40
codegen_flags: <defaults>
</compile_context>

<pallas_src>
import jax
import jax.numpy as jnp
from jax.experimental import pallas as pl
from jax.experimental.pallas import tpu as pltpu

LANE = 128
BATCH_TILE_CAP = 1024   # rows; ~3 MiB of double-buffered tiles, far below VMEM


def _round_up(x, m):
    return ((x + m - 1) // m) * m


def _tensorcores_per_chip():
    """Best-effort detection of TensorCores per chip (v7x has 2, v5e/v6e have 1)."""
    try:
        kind = (jax.devices()[0].device_kind or "").lower()
        if "v7" in kind or "tpu7" in kind:
            return 2
    except Exception:
        pass
    return 1


def _pick_tiling(B, n_cores, cap=BATCH_TILE_CAP):
    """Return (batch_tile, n_tiles).

    Single-TC chips (v5e/v6e): one grid step whenever B fits the cap -- the
    extra step is pure ~0.35us/step overhead since the weights never change.
    v7x (2 TCs): split large batches into an even number of tiles so both
    cores get balanced work; tiny batches stay single-step.
    """
    if n_cores <= 1:
        if B <= cap:
            return B, 1                      # block dims == full dims -> legal, no padding
        n_tiles = pl.cdiv(B, cap)
    else:
        if B <= 128:
            return B, 1
        n_tiles = max(2, pl.cdiv(B, cap))
        if n_tiles % 2:
            n_tiles += 1
    batch_tile = _round_up(pl.cdiv(B, n_tiles), 8)
    n_tiles = pl.cdiv(B, batch_tile)
    if n_cores == 2 and n_tiles > 1 and n_tiles % 2:
        n_tiles += 1                         # keep the 2 TCs load-balanced
    return batch_tile, n_tiles


def mlp_kernel(x_ref, w1_ref, w2_ref, w3_ref, w4_ref, b_ref, o_ref):
    """Full 4-layer MLP forward for one batch tile.

    All matmuls on the MXU (bf16 inputs, f32 accumulation); bias add + ReLU in
    f32 on the VPU.  x arrives as f32 and is cast to bf16 in-register here.
    """
    h_p = w1_ref.shape[1]            # padded hidden width (lane-dense, 128)
    out_cols = w4_ref.shape[1]       # real out_dim (un-padded output store)
    b = b_ref[...]                   # (4, >=128) f32, loaded once

    x = x_ref[...].astype(jnp.bfloat16)

    # Layer 1: Linear(in -> hidden) + ReLU  (K = in_dim, not 128)
    h = jnp.dot(x, w1_ref[...], preferred_element_type=jnp.float32)
    h = jnp.maximum(h + b[0:1, :h_p], 0.0)

    # Layer 2: Linear(hidden -> hidden) + ReLU
    h = jnp.dot(h.astype(jnp.bfloat16), w2_ref[...],
                preferred_element_type=jnp.float32)
    h = jnp.maximum(h + b[1:2, :h_p], 0.0)

    # Layer 3: Linear(hidden -> hidden) + ReLU
    h = jnp.dot(h.astype(jnp.bfloat16), w3_ref[...],
                preferred_element_type=jnp.float32)
    h = jnp.maximum(h + b[2:3, :h_p], 0.0)

    # Output layer: Linear(hidden -> out), no activation.  Only the real
    # out_dim columns are produced and stored (row-contiguous HBM block).
    out = jnp.dot(h.astype(jnp.bfloat16), w4_ref[...],
                  preferred_element_type=jnp.float32)
    o_ref[...] = (out + b[3:4, :out_cols]).astype(o_ref.dtype)


def pack_params(params):
    """One-time setup: cast weights to bf16, pad hidden width to 128 lanes,
    keep layer-1 rows at in_dim (rounded only to a sublane multiple) and the
    output columns un-padded; pack biases into one (4, 128) f32 block."""
    in_dim, hidden = params["w1"].shape
    out_dim = params["w4"].shape[1]
    in_p = _round_up(in_dim, 8)                  # sublane multiple is enough for K
    h_p = _round_up(hidden, LANE)                # lane-dense hidden activations
    b_lanes = max(h_p, _round_up(out_dim, LANE))

    def pad_w(w, rows, cols):
        return jnp.pad(
            w, ((0, rows - w.shape[0]), (0, cols - w.shape[1]))
        ).astype(jnp.bfloat16)

    b = jnp.zeros((4, b_lanes), jnp.float32)
    for i in range(1, 5):
        bi = params[f"b{i}"].reshape(-1)
        b = b.at[i - 1, : bi.shape[0]].set(bi)

    return {
        "w1": pad_w(params["w1"], in_p, h_p),
        "w2": pad_w(params["w2"], h_p, h_p),
        "w3": pad_w(params["w3"], h_p, h_p),
        "w4": pad_w(params["w4"], h_p, out_dim),   # output columns NOT padded
        "b": b,
        "in_dim": in_dim,
        "in_p": in_p,
        "out_dim": out_dim,
    }


def nn_model_forward(x, kparams, *, batch_tile=None, out_dtype=jnp.float32):
    """x: (B, in_dim) f32.  kparams: output of pack_params.
    Returns (B, out_dim) array of `out_dtype` (f32 default; bf16 halves the
    output writeback if the consumer allows it)."""
    B, in_dim = x.shape
    assert in_dim == kparams["in_dim"]
    in_p = kparams["in_p"]
    out_dim = kparams["out_dim"]

    n_cores = _tensorcores_per_chip()
    if batch_tile is None:
        batch_tile, n_tiles = _pick_tiling(B, n_cores)
    else:
        n_tiles = pl.cdiv(B, batch_tile)
        assert batch_tile % 8 == 0 or n_tiles == 1
    B_pad = batch_tile * n_tiles

    # Only pad when actually required (never in the common aligned case):
    # extra batch rows for multi-tile grids, or feature dim up to a sublane
    # multiple.  No bf16 cast / 128-lane padding pass over x any more.
    if B_pad != B or in_p != in_dim:
        x_in = jnp.pad(x, ((0, B_pad - B), (0, in_p - in_dim)))
    else:
        x_in = x

    def full_spec(shape):
        return pl.BlockSpec(shape, lambda i: (0,) * len(shape))

    if n_cores == 2 and n_tiles >= 2 and n_tiles % 2 == 0:
        dim_sem = (pltpu.CORE_PARALLEL,)        # shard batch tiles across v7x's 2 TCs
    elif n_tiles > 1:
        dim_sem = ("parallel",)
    else:
        dim_sem = ("arbitrary",)

    grid_spec = pltpu.PrefetchScalarGridSpec(
        num_scalar_prefetch=0,
        grid=(n_tiles,),
        in_specs=[
            pl.BlockSpec((batch_tile, in_p), lambda i: (i, 0)),   # x tile (f32)
            full_spec(kparams["w1"].shape),
            full_spec(kparams["w2"].shape),
            full_spec(kparams["w3"].shape),
            full_spec(kparams["w4"].shape),
            full_spec(kparams["b"].shape),                        # packed biases
        ],
        out_specs=pl.BlockSpec((batch_tile, out_dim), lambda i: (i, 0)),
    )

    out = pl.pallas_call(
        mlp_kernel,
        out_shape=jax.ShapeDtypeStruct((B_pad, out_dim), out_dtype),
        grid_spec=grid_spec,
        compiler_params=pltpu.CompilerParams(dimension_semantics=dim_sem),
    )(x_in,
      kparams["w1"], kparams["w2"], kparams["w3"], kparams["w4"],
      kparams["b"])

    return out if B_pad == B else out[:B]


def init_params(key, in_dim, out_dim, hidden_dim=64):
    """Deterministic init mimicking torch.nn.Linear default (U[-1/sqrt(fan_in), +])."""
    dims = [(in_dim, hidden_dim),
            (hidden_dim, hidden_dim),
            (hidden_dim, hidden_dim),
            (hidden_dim, out_dim)]
    params = {}
    for idx, (fan_in, fan_out) in enumerate(dims, start=1):
        key, kw, kb = jax.random.split(key, 3)
        bound = float(fan_in) ** -0.5
        params[f"w{idx}"] = jax.random.uniform(
            kw, (fan_in, fan_out), jnp.float32, minval=-bound, maxval=bound)
        params[f"b{idx}"] = jax.random.uniform(
            kb, (1, fan_out), jnp.float32, minval=-bound, maxval=bound)
    return params


def reference_forward(x, params):
    """Pure-JAX reference mirroring the kernel numerics (bf16 MXU inputs, f32
    accumulation, f32 bias/ReLU).  Padding is exact zeros so it is invisible."""
    h = x.astype(jnp.bfloat16)
    for i in (1, 2, 3):
        h = jnp.dot(h, params[f"w{i}"].astype(jnp.bfloat16),
                    preferred_element_type=jnp.float32) + params[f"b{i}"]
        h = jnp.maximum(h, 0.0).astype(jnp.bfloat16)
    return jnp.dot(h, params["w4"].astype(jnp.bfloat16),
                   preferred_element_type=jnp.float32) + params["b4"]


if __name__ == "__main__":
    key = jax.random.PRNGKey(0)
    k_param, k_x = jax.random.split(key)

    # Small DQN-style shapes; hidden_dim=64 as in the module.
    batch, in_dim, out_dim, hidden = 64, 32, 8, 64
    params = init_params(k_param, in_dim, out_dim, hidden)
    x = jax.random.normal(k_x, (batch, in_dim), jnp.float32)

    kparams = pack_params(params)
    out = jax.block_until_ready(nn_model_forward(x, kparams))

    ref = reference_forward(x, params)
    assert out.shape == (batch, out_dim)
    max_abs = float(jnp.max(jnp.abs(out - ref)))
    scale = float(jnp.max(jnp.abs(ref))) + 1e-6
    assert jnp.allclose(out, ref, atol=2e-3, rtol=2e-3) or (max_abs / scale) < 2e-3, (
        f"mismatch vs reference: max abs diff = {max_abs}, rel = {max_abs / scale}")

    print("KERNEL_OK")
</pallas_src>

<mosaic_0001>
module attributes {stable_mosaic.version = 11 : i64} {
  func.func @mlp_kernel(%arg0: i32, %arg1: memref<64x32xf32, #tpu.memory_space<vmem>>, %arg2: memref<32x128xbf16, #tpu.memory_space<vmem>>, %arg3: memref<128x128xbf16, #tpu.memory_space<vmem>>, %arg4: memref<128x128xbf16, #tpu.memory_space<vmem>>, %arg5: memref<128x8xbf16, #tpu.memory_space<vmem>>, %arg6: memref<4x128xf32, #tpu.memory_space<vmem>>, %arg7: memref<64x8xf32, #tpu.memory_space<vmem>>) attributes {dimension_semantics = [#tpu.dimension_semantics<arbitrary>], iteration_bounds = array<i64: 1>, scalar_prefetch = 0 : i64, scratch_operands = 0 : i64, tpu.core_type = #tpu.core_type<tc>, window_params = [{transform_indices = @transform_0, window_bounds = array<i64: 64, 32>}, {pipeline_mode = #tpu.pipeline_mode<synchronous>, transform_indices = @transform_1, window_bounds = array<i64: 32, 128>}, {pipeline_mode = #tpu.pipeline_mode<synchronous>, transform_indices = @transform_2, window_bounds = array<i64: 128, 128>}, {pipeline_mode = #tpu.pipeline_mode<synchronous>, transform_indices = @transform_3, window_bounds = array<i64: 128, 128>}, {pipeline_mode = #tpu.pipeline_mode<synchronous>, transform_indices = @transform_4, window_bounds = array<i64: 128, 8>}, {pipeline_mode = #tpu.pipeline_mode<synchronous>, transform_indices = @transform_5, window_bounds = array<i64: 4, 128>}, {transform_indices = @transform_6, window_bounds = array<i64: 64, 8>}]} {
    %c0 = arith.constant 0 : index
    %c0_0 = arith.constant 0 : index
    %0 = vector.load %arg6[%c0, %c0_0] : memref<4x128xf32, #tpu.memory_space<vmem>>, vector<4x128xf32>
    %c0_1 = arith.constant 0 : index
    %c0_2 = arith.constant 0 : index
    %1 = vector.load %arg1[%c0_1, %c0_2] : memref<64x32xf32, #tpu.memory_space<vmem>>, vector<64x32xf32>
    %2 = arith.truncf %1 : vector<64x32xf32> to vector<64x32xbf16>
    %c0_3 = arith.constant 0 : index
    %c0_4 = arith.constant 0 : index
    %3 = vector.load %arg2[%c0_3, %c0_4] : memref<32x128xbf16, #tpu.memory_space<vmem>>, vector<32x128xbf16>
    %cst = arith.constant dense<0.000000e+00> : vector<64x128xf32>
    %4 = tpu.matmul %2, %3, %cst {dimension_numbers = #tpu.dot_dimension_numbers<[1], [0], [0], [1], [0, 0, 1, 1], [], []>} : vector<64x32xbf16>, vector<32x128xbf16>, vector<64x128xf32> -> vector<64x128xf32>
    %5 = vector.extract_strided_slice %0 {offsets = [0, 0], sizes = [1, 128], strides = [1, 1]} : vector<4x128xf32> to vector<1x128xf32>
    %6 = vector.broadcast %5 : vector<1x128xf32> to vector<64x128xf32>
    %7 = arith.addf %4, %6 : vector<64x128xf32>
    %cst_5 = arith.constant 0.000000e+00 : f32
    %8 = vector.broadcast %cst_5 : f32 to vector<64x128xf32>
    %9 = arith.maximumf %7, %8 : vector<64x128xf32>
    %10 = arith.truncf %9 : vector<64x128xf32> to vector<64x128xbf16>
    %c0_6 = arith.constant 0 : index
    %c0_7 = arith.constant 0 : index
    %11 = vector.load %arg3[%c0_6, %c0_7] : memref<128x128xbf16, #tpu.memory_space<vmem>>, vector<128x128xbf16>
    %cst_8 = arith.constant dense<0.000000e+00> : vector<64x128xf32>
    %12 = tpu.matmul %10, %11, %cst_8 {dimension_numbers = #tpu.dot_dimension_numbers<[1], [0], [0], [1], [0, 0, 1, 1], [], []>} : vector<64x128xbf16>, vector<128x128xbf16>, vector<64x128xf32> -> vector<64x128xf32>
    %13 = vector.extract_strided_slice %0 {offsets = [1, 0], sizes = [1, 128], strides = [1, 1]} : vector<4x128xf32> to vector<1x128xf32>
    %14 = vector.broadcast %13 : vector<1x128xf32> to vector<64x128xf32>
    %15 = arith.addf %12, %14 : vector<64x128xf32>
    %cst_9 = arith.constant 0.000000e+00 : f32
    %16 = vector.broadcast %cst_9 : f32 to vector<64x128xf32>
    %17 = arith.maximumf %15, %16 : vector<64x128xf32>
    %18 = arith.truncf %17 : vector<64x128xf32> to vector<64x128xbf16>
    %c0_10 = arith.constant 0 : index
    %c0_11 = arith.constant 0 : index
    %19 = vector.load %arg4[%c0_10, %c0_11] : memref<128x128xbf16, #tpu.memory_space<vmem>>, vector<128x128xbf16>
    %cst_12 = arith.constant dense<0.000000e+00> : vector<64x128xf32>
    %20 = tpu.matmul %18, %19, %cst_12 {dimension_numbers = #tpu.dot_dimension_numbers<[1], [0], [0], [1], [0, 0, 1, 1], [], []>} : vector<64x128xbf16>, vector<128x128xbf16>, vector<64x128xf32> -> vector<64x128xf32>
    %21 = vector.extract_strided_slice %0 {offsets = [2, 0], sizes = [1, 128], strides = [1, 1]} : vector<4x128xf32> to vector<1x128xf32>
    %22 = vector.broadcast %21 : vector<1x128xf32> to vector<64x128xf32>
    %23 = arith.addf %20, %22 : vector<64x128xf32>
    %cst_13 = arith.constant 0.000000e+00 : f32
    %24 = vector.broadcast %cst_13 : f32 to vector<64x128xf32>
    %25 = arith.maximumf %23, %24 : vector<64x128xf32>
    %26 = arith.truncf %25 : vector<64x128xf32> to vector<64x128xbf16>
    %c0_14 = arith.constant 0 : index
    %c0_15 = arith.constant 0 : index
    %27 = vector.load %arg5[%c0_14, %c0_15] : memref<128x8xbf16, #tpu.memory_space<vmem>>, vector<128x8xbf16>
    %cst_16 = arith.constant dense<0.000000e+00> : vector<64x8xf32>
    %28 = tpu.matmul %26, %27, %cst_16 {dimension_numbers = #tpu.dot_dimension_numbers<[1], [0], [0], [1], [0, 0, 1, 1], [], []>} : vector<64x128xbf16>, vector<128x8xbf16>, vector<64x8xf32> -> vector<64x8xf32>
    %29 = vector.extract_strided_slice %0 {offsets = [3, 0], sizes = [1, 8], strides = [1, 1]} : vector<4x128xf32> to vector<1x8xf32>
    %30 = vector.broadcast %29 : vector<1x8xf32> to vector<64x8xf32>
    %31 = arith.addf %28, %30 : vector<64x8xf32>
    %c0_17 = arith.constant 0 : index
    %c0_18 = arith.constant 0 : index
    %32 = vector.load %arg7[%c0_17, %c0_18] : memref<64x8xf32, #tpu.memory_space<vmem>>, vector<64x8xf32>
    tpu.vector_store %arg7[%c0_17, %c0_18], %31 {strides = array<i32>} : memref<64x8xf32, #tpu.memory_space<vmem>>, vector<64x8xf32>,
    return
  }
  func.func @transform_0(%arg0: i32) -> (i32, i32) {
    %c0_i32 = arith.constant 0 : i32
    %c0_i32_0 = arith.constant 0 : i32
    return %arg0, %c0_i32 : i32, i32
  }
  func.func @transform_1(%arg0: i32) -> (i32, i32) {
    %c0_i32 = arith.constant 0 : i32
    %c0_i32_0 = arith.constant 0 : i32
    %c0_i32_1 = arith.constant 0 : i32
    return %c0_i32, %c0_i32_0 : i32, i32
  }
  func.func @transform_2(%arg0: i32) -> (i32, i32) {
    %c0_i32 = arith.constant 0 : i32
    %c0_i32_0 = arith.constant 0 : i32
    %c0_i32_1 = arith.constant 0 : i32
    return %c0_i32, %c0_i32_0 : i32, i32
  }
  func.func @transform_3(%arg0: i32) -> (i32, i32) {
    %c0_i32 = arith.constant 0 : i32
    %c0_i32_0 = arith.constant 0 : i32
    %c0_i32_1 = arith.constant 0 : i32
    return %c0_i32, %c0_i32_0 : i32, i32
  }
  func.func @transform_4(%arg0: i32) -> (i32, i32) {
    %c0_i32 = arith.constant 0 : i32
    %c0_i32_0 = arith.constant 0 : i32
    %c0_i32_1 = arith.constant 0 : i32
    return %c0_i32, %c0_i32_0 : i32, i32
  }
  func.func @transform_5(%arg0: i32) -> (i32, i32) {
    %c0_i32 = arith.constant 0 : i32
    %c0_i32_0 = arith.constant 0 : i32
    %c0_i32_1 = arith.constant 0 : i32
    return %c0_i32, %c0_i32_0 : i32, i32
  }
  func.func @transform_6(%arg0: i32) -> (i32, i32) {
    %c0_i32 = arith.constant 0 : i32
    %c0_i32_0 = arith.constant 0 : i32
    return %arg0, %c0_i32 : i32, i32
  }
}

</mosaic_0001>

<bundles_post_ra>
// kernel: tpu_custom_call.1
= control target key start
LH: loop header
LB: loop body
LE: loop exit
PB: predicated region body
PF: predicated region fallthrough
CT: control target
= control target key end

     0   :  { %vm57_vm0 = vcmask 261120   ;;  %v41_v27 = vlaneseq  ;;  %vm570_vm1 = vcmask 64512   ;;  %s953_s1 = inlined_call_operand.vmem [shape: bf16[32,128], index: 1, kind: input, shape index: {}]   ;;  %s954_s0 = inlined_call_operand.vmem [shape: f32[64,32], index: 0, kind: input, shape index: {}]   ;;  %s955_s2 = inlined_call_operand.vmem [shape: bf16[128,128], index: 2, kind: input, shape index: {}]   ;;  %s956_s3 = inlined_call_operand.vmem [shape: bf16[128,128], index: 3, kind: input, shape index: {}]   ;;  %s957_s5 = inlined_call_operand.vmem [shape: f32[4,128], index: 5, kind: input, shape index: {}]   ;;  %s958_s4 = inlined_call_operand.vmem [shape: bf16[128,8], index: 4, kind: input, shape index: {}]   ;;  %s959_s6 = inlined_call_operand.vmem [shape: f32[64,8], index: 6, kind: output, shape index: {}]  }
   0x1   :  { %v739_v0 = vld [vmem:[%s953_s1 + $0x8] sm:$0xff]   ;;  %v740_v1 = vld [vmem:[%s953_s1] sm:$0xff]   ;;  %v27_v5 = vld [vmem:[%s954_s0 + $0x10] sm:$0xff] }
   0x2   :  { %655 = vmatprep.subr.bf16.mxu0 %v739_v0  ;;  %v25_v2 = vld [vmem:[%s954_s0] sm:$0xff]  ;;  %v26_v3 = vld [vmem:[%s954_s0 + $0x8] sm:$0xff]  ;;  %v28_v6 = vld [vmem:[%s954_s0 + $0x18] sm:$0xff]  ;;  %v873_v28 = vshrl.u32 %v41_v27, 7 }
   0x3   :  { %656 = vmatpush3.bf16.msra.mxu0 %v739_v0  ;;  %v33_v4 = vpack.c.bf16 %v26_v3, %v25_v2  ;;  %v29_v7 = vld [vmem:[%s954_s0 + $0x20] sm:$0xff]  ;;  %v30_v8 = vld [vmem:[%s954_s0 + $0x28] sm:$0xff]  ;;  %v741_v9 = vld [vmem:[%s955_s2 + $0x38] sm:$0xff]   ;;  %v34_v10 = vpack.c.bf16 %v28_v6, %v27_v5 }
   0x4   :  { %657 = vmatprep.subr.bf16.mxu0 %v740_v1  ;;  %v742_v11 = vld [vmem:[%s955_s2 + $0x30] sm:$0xff]   ;;  %v35_v12 = vpack.c.bf16 %v30_v8, %v29_v7  ;;  %667 = vmatprep.subr.bf16.mxu1 %v741_v9  ;;  %v32_v14 = vld [vmem:[%s954_s0 + $0x38] sm:$0xff]  ;;  %v743_v15 = vld [vmem:[%s955_s2 + $0x28] sm:$0xff]   ;;  %v43_v29 = vsub.s32 0, %v873_v28 }
   0x5   :  { %659 = vmatprep.mubr.msk.bf16.mxu0 %vm57_vm0, %v33_v4  ;;  %668 = vmatpush3.bf16.msra.mxu1 %v741_v9  ;;  %v31_v13 = vld [vmem:[%s954_s0 + $0x30] sm:$0xff]  ;;  %v744_v16 = vld [vmem:[%s955_s2 + $0x20] sm:$0xff]   ;;  %v745_v18 = vld [vmem:[%s955_s2 + $0x18] sm:$0xff]   ;;  %v165_v4 = vsub.s32 1, %v873_v28 }
   0x6   :  { %669 = vmatprep.subr.bf16.mxu1 %v742_v11  ;;  %v36_v17 = vpack.c.bf16 %v32_v14, %v31_v13  ;;  %v746_v19 = vld [vmem:[%s955_s2 + $0x10] sm:$0xff]   ;;  %v747_v20 = vld [vmem:[%s955_s2 + $0x8] sm:$0xff]   ;;  %v748_v21 = vld [vmem:[%s955_s2] sm:$0xff]  }
   0x7   :  { %658 = vmatpush3.bf16.msra.mxu0 %v740_v1  ;;  %v749_v22 = vld [vmem:[%s956_s3 + $0x38] sm:$0xff]   ;;  %v750_v23 = vld [vmem:[%s956_s3 + $0x30] sm:$0xff]   ;;  %v751_v24 = vld [vmem:[%s956_s3 + $0x28] sm:$0xff]  }
   0x8   :  { %691 = vmatprep.subr.bf16.mxu0 %v749_v22  ;;  %v752_v25 = vld [vmem:[%s956_s3 + $0x20] sm:$0xff]   ;;  %v753_v26 = vld [vmem:[%s956_s3 + $0x18] sm:$0xff]   ;;  %v754_v60 = vld [vmem:[%s956_s3 + $0x10] sm:$0xff]  }
   0x9   :  { %670 = vmatpush3.bf16.msra.mxu1 %v742_v11  ;;  %v879_v30 = vld [vmem:[%s957_s5] sm:$0xf]  ;;  %v755_v61 = vld [vmem:[%s956_s3 + $0x8] sm:$0xff]   ;;  %v757_v63 = vld [vmem:[%s958_s4 + $0x38] sm:$0xff]  }
   0xa   :  { %660 = vmatmul.mubr.msk.bf16.vlgmr.msra.gmra.mxu0 %vm57_vm0, %v34_v10  ;;  %671 = vmatprep.subr.bf16.mxu1 %v743_v15  ;;  %v44_v32 = vrot.slane %v879_v30, %v43_v29  ;;  %v756_v62 = vld [vmem:[%s956_s3] sm:$0xff]   ;;  %v758_v0 = vld [vmem:[%s958_s4 + $0x30] sm:$0xff]   ;;  %v759_v1 = vld [vmem:[%s958_s4 + $0x28] sm:$0xff]   ;;  %v166_v6 = vrot.slane %v879_v30, %v165_v4 }
   0xb   :  { %663 = vmatprep.mubr.msk.bf16.mxu0 %vm57_vm0, %v35_v12  ;;  %692 = vmatpush3.bf16.msra.mxu0 %v749_v22  ;;  %v760_v2 = vld [vmem:[%s958_s4 + $0x20] sm:$0xff]   ;;  %v761_v3 = vld [vmem:[%s958_s4 + $0x18] sm:$0xff]  }
   0xc   :  { %693 = vmatprep.subr.bf16.mxu0 %v750_v23 }
   0xd   :  { %672 = vmatpush3.bf16.msra.mxu1 %v743_v15 }
   0xe   :  { %673 = vmatprep.subr.bf16.mxu1 %v744_v16 }
   0xf   :  { %694 = vmatpush3.bf16.msra.mxu0 %v750_v23 }
  0x10   :  { %695 = vmatprep.subr.bf16.mxu0 %v751_v24 }
  0x11   :  { %674 = vmatpush3.bf16.msra.mxu1 %v744_v16 }
  0x12   :  { %664 = vmatmul.mubr.msk.bf16.gmra.mxu0 %vm57_vm0, %v36_v17  ;;  %675 = vmatprep.subr.bf16.mxu1 %v745_v18 }
  0x13   :  { %696 = vmatpush3.bf16.msra.mxu0 %v751_v24 }
  0x14   :  { %697 = vmatprep.subr.bf16.mxu0 %v752_v25 }
  0x15   :  { %676 = vmatpush3.bf16.msra.mxu1 %v745_v18 }
  0x16   :  { %677 = vmatprep.subr.bf16.mxu1 %v746_v19 }
  0x17   :  { %698 = vmatpush3.bf16.msra.mxu0 %v752_v25 }
  0x18   :  { %699 = vmatprep.subr.bf16.mxu0 %v753_v26 }
  0x19   :  { %678 = vmatpush3.bf16.msra.mxu1 %v746_v19 }
  0x1a   :  { %679 = vmatprep.subr.bf16.mxu1 %v747_v20 }
  0x1b   :  { %700 = vmatpush3.bf16.msra.mxu0 %v753_v26 }
  0x1c   :  { %701 = vmatprep.subr.bf16.mxu0 %v754_v60 }
  0x1d   :  { %680 = vmatpush3.bf16.msra.mxu1 %v747_v20 }
  0x1e   :  { %681 = vmatprep.subr.bf16.mxu1 %v748_v21 }
  0x1f   :  { %702 = vmatpush3.bf16.msra.mxu0 %v754_v60 }
  0x20   :  { %703 = vmatprep.subr.bf16.mxu0 %v755_v61 }
  0x21   :  { %682 = vmatpush3.bf16.msra.mxu1 %v748_v21 }
  0x22   :  { %715 = vmatprep.subr.bf16.mxu1 %v757_v63 }
  0x23   :  { %704 = vmatpush3.bf16.msra.mxu0 %v755_v61 }
  0x24   :  { %705 = vmatprep.subr.bf16.mxu0 %v756_v62 }
  0x27   :  { %706 = vmatpush3.bf16.msra.mxu0 %v756_v62 }
  0xca   :  { %v661_v31 = vpop.f32.mrf.mxu0 }
  0xcb   :  { %v113_v37 = vadd.f32 %v661_v31, %v44_v32 }
  0xcc   :  { %v104_v33 = vpop.f32.mrf.mxu0 }
  0xcd   :  { %v105_v35 = vadd.f32 %v104_v33, %v44_v32  ;;  %v137_v44 = vmax.f32 %v113_v37, 0.0  ;;  %v763_v37 = vld [vmem:[%s958_s4 + $0x8] sm:$0xff]  }
  0xce   :  { %v662_v34 = vpop.f32.mrf.mxu0 }
  0xcf   :  { %v116_v36 = vadd.f32 %v662_v34, %v44_v32  ;;  %v135_v42 = vmax.f32 %v105_v35, 0.0 }
  0xd0   :  { %v107_v38 = vpop.f32.mrf.mxu0 }
  0xd1   :  { %v108_v39 = vadd.f32 %v107_v38, %v44_v32  ;;  %v138_v40 = vmax.f32 %v116_v36, 0.0  ;;  %v762_v36 = vld [vmem:[%s958_s4 + $0x10] sm:$0xff]   ;;  %v764_v38 = vld [vmem:[%s958_s4] sm:$0xff]  }
  0xd2   :  { %v665_v41 = vpop.f32.mrf.mxu0 }
  0xd3   :  { %v136_v43 = vmax.f32 %v108_v39, 0.0  ;;  %v144_v47 = vpack.c.bf16 %v138_v40, %v137_v44  ;;  %v129_v51 = vadd.f32 %v665_v41, %v44_v32  ;;  %v310_v39 = vsub.s32 2, %v873_v28 }
  0xd4   :  { %v120_v45 = vpop.f32.mrf.mxu0 }
  0xd5   :  { %v143_v46 = vpack.c.bf16 %v136_v43, %v135_v42  ;;  %v121_v49 = vadd.f32 %v120_v45, %v44_v32  ;;  %v141_v57 = vmax.f32 %v129_v51, 0.0  ;;  %v311_v41 = vrot.slane %v879_v30, %v310_v39 }
  0xd6   :  { %v666_v48 = vpop.f32.mrf.mxu0 }
  0xd7   :  { %v132_v50 = vadd.f32 %v666_v48, %v44_v32  ;;  %683 = vmatprep.mubr.bf16.mxu1 %v143_v46  ;;  %v139_v55 = vmax.f32 %v121_v49, 0.0 }
  0xd8   :  { %v123_v52 = vpop.f32.mrf.mxu0  ;;  %684 = vmatmul.mubr.bf16.vlgmr.msra.gmra.mxu1 %v144_v47 }
  0xd9   :  { %v124_v53 = vadd.f32 %v123_v52, %v44_v32  ;;  %v142_v54 = vmax.f32 %v132_v50, 0.0  ;;  %716 = vmatpush3.bf16.msra.mxu1 %v757_v63 }
  0xda   :  { %717 = vmatprep.subr.bf16.mxu1 %v758_v0 }
  0xdb   :  { %v140_v56 = vmax.f32 %v124_v53, 0.0  ;;  %v146_v59 = vpack.c.bf16 %v142_v54, %v141_v57 }
  0xdd   :  { %v145_v58 = vpack.c.bf16 %v140_v56, %v139_v55  ;;  %718 = vmatpush3.bf16.msra.mxu1 %v758_v0 }
  0xde   :  { %719 = vmatprep.subr.bf16.mxu1 %v759_v1 }
  0xdf   :  { %687 = vmatprep.mubr.bf16.mxu1 %v145_v58 }
  0xe0   :  { %688 = vmatmul.mubr.bf16.gmra.mxu1 %v146_v59 }
  0xe1   :  { %720 = vmatpush3.bf16.msra.mxu1 %v759_v1 }
  0xe2   :  { %721 = vmatprep.subr.bf16.mxu1 %v760_v2 }
  0xe5   :  { %722 = vmatpush3.bf16.msra.mxu1 %v760_v2 }
  0xe6   :  { %723 = vmatprep.subr.bf16.mxu1 %v761_v3 }
  0xe9   :  { %724 = vmatpush3.bf16.msra.mxu1 %v761_v3 }
  0xea   :  { %725 = vmatprep.subr.bf16.mxu1 %v762_v36 }
  0xed   :  { %726 = vmatpush3.bf16.msra.mxu1 %v762_v36 }
  0xee   :  { %727 = vmatprep.subr.bf16.mxu1 %v763_v37 }
  0xf1   :  { %728 = vmatpush3.bf16.msra.mxu1 %v763_v37 }
  0xf2   :  { %729 = vmatprep.subr.bf16.mxu1 %v764_v38 }
  0xf5   :  { %730 = vmatpush3.bf16.msra.mxu1 %v764_v38 }
 0x198   :  { %v685_v5 = vpop.f32.mrf.mxu1 }
 0x199   :  { %v258_v11 = vadd.f32 %v685_v5, %v166_v6  ;;  %v455_v5 = vsub.s32 3, %v873_v28 }
 0x19a   :  { %v249_v7 = vpop.f32.mrf.mxu1 }
 0x19b   :  { %v250_v9 = vadd.f32 %v249_v7, %v166_v6  ;;  %v282_v18 = vmax.f32 %v258_v11, 0.0 }
 0x19c   :  { %v686_v8 = vpop.f32.mrf.mxu1 }
 0x19d   :  { %v261_v10 = vadd.f32 %v686_v8, %v166_v6  ;;  %v280_v16 = vmax.f32 %v250_v9, 0.0 }
 0x19e   :  { %v252_v12 = vpop.f32.mrf.mxu1 }
 0x19f   :  { %v253_v13 = vadd.f32 %v252_v12, %v166_v6  ;;  %v283_v14 = vmax.f32 %v261_v10, 0.0 }
 0x1a0   :  { %v689_v15 = vpop.f32.mrf.mxu1 }
 0x1a1   :  { %v281_v17 = vmax.f32 %v253_v13, 0.0  ;;  %v289_v21 = vpack.c.bf16 %v283_v14, %v282_v18  ;;  %v274_v25 = vadd.f32 %v689_v15, %v166_v6 }
 0x1a2   :  { %v265_v19 = vpop.f32.mrf.mxu1 }
 0x1a3   :  { %v288_v20 = vpack.c.bf16 %v281_v17, %v280_v16  ;;  %v266_v23 = vadd.f32 %v265_v19, %v166_v6  ;;  %v286_v33 = vmax.f32 %v274_v25, 0.0 }
 0x1a4   :  { %v690_v22 = vpop.f32.mrf.mxu1 }
 0x1a5   :  { %v277_v24 = vadd.f32 %v690_v22, %v166_v6  ;;  %707 = vmatprep.mubr.bf16.mxu0 %v288_v20  ;;  %v284_v31 = vmax.f32 %v266_v23, 0.0 }
 0x1a6   :  { %v268_v26 = vpop.f32.mrf.mxu1  ;;  %708 = vmatmul.mubr.bf16.vlgmr.msra.gmra.mxu0 %v289_v21 }
 0x1a7   :  { %v269_v27 = vadd.f32 %v268_v26, %v166_v6  ;;  %v287_v29 = vmax.f32 %v277_v24, 0.0  ;;  %v456_v6 = vrot.slane %v879_v30, %v455_v5 }
 0x1a9   :  { %v285_v32 = vmax.f32 %v269_v27, 0.0  ;;  %v291_v35 = vpack.c.bf16 %v287_v29, %v286_v33 }
 0x1ab   :  { %v290_v34 = vpack.c.bf16 %v285_v32, %v284_v31 }
 0x1ad   :  { %711 = vmatprep.mubr.bf16.mxu0 %v290_v34 }
 0x1ae   :  { %712 = vmatmul.mubr.bf16.gmra.mxu0 %v291_v35 }
 0x266   :  { %v709_v40 = vpop.f32.mrf.mxu0 }
 0x267   :  { %v403_v46 = vadd.f32 %v709_v40, %v311_v41 }
 0x268   :  { %v394_v42 = vpop.f32.mrf.mxu0 }
 0x269   :  { %v395_v44 = vadd.f32 %v394_v42, %v311_v41  ;;  %v427_v53 = vmax.f32 %v403_v46, 0.0 }
 0x26a   :  { %v710_v43 = vpop.f32.mrf.mxu0 }
 0x26b   :  { %v406_v45 = vadd.f32 %v710_v43, %v311_v41  ;;  %v425_v51 = vmax.f32 %v395_v44, 0.0 }
 0x26c   :  { %v397_v47 = vpop.f32.mrf.mxu0 }
 0x26d   :  { %v398_v48 = vadd.f32 %v397_v47, %v311_v41  ;;  %v428_v49 = vmax.f32 %v406_v45, 0.0 }
 0x26e   :  { %v713_v50 = vpop.f32.mrf.mxu0 }
 0x26f   :  { %v426_v52 = vmax.f32 %v398_v48, 0.0  ;;  %v434_v56 = vpack.c.bf16 %v428_v49, %v427_v53  ;;  %v419_v60 = vadd.f32 %v713_v50, %v311_v41 }
 0x270   :  { %v410_v54 = vpop.f32.mrf.mxu0 }
 0x271   :  { %v433_v55 = vpack.c.bf16 %v426_v52, %v425_v51  ;;  %v411_v58 = vadd.f32 %v410_v54, %v311_v41  ;;  %v431_v2 = vmax.f32 %v419_v60, 0.0 }
 0x272   :  { %v714_v57 = vpop.f32.mrf.mxu0 }
 0x273   :  { %v422_v59 = vadd.f32 %v714_v57, %v311_v41  ;;  %731 = vmatprep.mubr.bf16.mxu1 %v433_v55  ;;  %v429_v0 = vmax.f32 %v411_v58, 0.0 }
 0x274   :  { %v413_v61 = vpop.f32.mrf.mxu0  ;;  %732 = vmatmul.mubr.bf16.vlgmr.msra.gmra.mxu1 %v434_v56 }
 0x275   :  { %v414_v62 = vadd.f32 %v413_v61, %v311_v41  ;;  %v432_v63 = vmax.f32 %v422_v59, 0.0 }
 0x277   :  { %v430_v1 = vmax.f32 %v414_v62, 0.0  ;;  %v436_v4 = vpack.c.bf16 %v432_v63, %v431_v2 }
 0x279   :  { %v435_v3 = vpack.c.bf16 %v430_v1, %v429_v0 }
 0x27b   :  { %735 = vmatprep.mubr.bf16.mxu1 %v435_v3 }
 0x27c   :  { %736 = vmatmul.mubr.bf16.gmra.mxu1 %v436_v4 }
 0x334   :  { %v733_v7 = vpop.f32.mrf.mxu1 }
 0x335   :  { %v548_v8 = vadd.f32 %v733_v7, %v456_v6 }
 0x336   :  { %v539_v9 = vpop.f32.mrf.mxu1 }
 0x337   :  { %573 = vst.msk [vmem:[%s959_s6 + $0x10] sm:$0xff] %vm570_vm1, %v548_v8  ;;  %v540_v10 = vadd.f32 %v539_v9, %v456_v6 }
 0x338   :  { %v734_v11 = vpop.f32.mrf.mxu1 }
 0x339   :  { %571 = vst.msk [vmem:[%s959_s6] sm:$0xff] %vm570_vm1, %v540_v10  ;;  %v551_v12 = vadd.f32 %v734_v11, %v456_v6 }
 0x33a   :  { %v542_v28 = vpop.f32.mrf.mxu1 }
 0x33b   :  { %574 = vst.msk [vmem:[%s959_s6 + $0x18] sm:$0xff] %vm570_vm1, %v551_v12  ;;  %v543_v30 = vadd.f32 %v542_v28, %v456_v6 }
 0x33c   :  { %v737_v13 = vpop.f32.mrf.mxu1 }
 0x33d   :  { %572 = vst.msk [vmem:[%s959_s6 + $0x8] sm:$0xff] %vm570_vm1, %v543_v30  ;;  %v564_v14 = vadd.f32 %v737_v13, %v456_v6 }
 0x33e   :  { %v555_v15 = vpop.f32.mrf.mxu1 }
 0x33f   :  { %577 = vst.msk [vmem:[%s959_s6 + $0x30] sm:$0xff] %vm570_vm1, %v564_v14  ;;  %v556_v16 = vadd.f32 %v555_v15, %v456_v6 }
 0x340   :  { %v738_v17 = vpop.f32.mrf.mxu1 }
 0x341   :  { %575 = vst.msk [vmem:[%s959_s6 + $0x20] sm:$0xff] %vm570_vm1, %v556_v16  ;;  %v567_v18 = vadd.f32 %v738_v17, %v456_v6 }
 0x342   :  { %v558_v19 = vpop.f32.mrf.mxu1 }
 0x343   :  { %578 = vst.msk [vmem:[%s959_s6 + $0x38] sm:$0xff] %vm570_vm1, %v567_v18  ;;  %v559_v20 = vadd.f32 %v558_v19, %v456_v6 }
 0x345   :  { %576 = vst.msk [vmem:[%s959_s6 + $0x28] sm:$0xff] %vm570_vm1, %v559_v20 }

</bundles_post_ra>
